<compile_context>
chip_gen: v6e
topology: v6e:2x2x1
jax: 0.10.0
libtpu: 0.0.40
codegen_flags: <defaults>
</compile_context>

<pallas_src>
import math

import jax
import jax.numpy as jnp
from jax.experimental import pallas as pl
from jax.experimental.pallas import tpu as pltpu


def _packed_linear_kernel(x_ref, w_ref, b_ref, o_ref):
    # x_ref: [TMP, K]  packed input rows (K = PACK * in_features), native dtype
    # w_ref: [K, N]    block-diagonal weight (N = PACK * out_features), f32, resident
    # b_ref: [1, N]    tiled bias row, f32, resident
    # o_ref: [TMP, N]  packed output rows; (mp, N) row-major == (m_pad, out_f)
    x = x_ref[...].astype(jnp.float32)
    y = jnp.dot(x, w_ref[...], preferred_element_type=jnp.float32)
    o_ref[...] = (y + b_ref[...]).astype(o_ref.dtype)


def _choose_pack(m: int) -> tuple[int, bool]:
    """Largest row-pack factor that divides m (no pad copy), else pad to 12."""
    for p in (12, 8, 6, 4):
        if m % p == 0:
            return p, False
    return 12, True


def nelf_forward(x, weight, bias, *, block_rows=49152, min_pallas_rows=4096):
    """NeLFNet.forward: y = x @ weight.T + bias   (nn.Linear(10, 5)).

    x:      [..., in_features]
    weight: [out_features, in_features]   (PyTorch layout)
    bias:   [out_features]
    returns [..., out_features]
    """
    out_f, in_f = weight.shape
    assert x.shape[-1] == in_f
    lead = x.shape[:-1]
    m = math.prod(lead) if lead else 1

    out_dtype = jnp.promote_types(x.dtype, weight.dtype)
    x2d = x.reshape(m, in_f)                       # native dtype, no cast pass
    w_f32 = weight.astype(jnp.float32)

    # Tiny-M fast path: pallas_call launch + per-step pipeline overhead would
    # dwarf the work; plain fused XLA is strictly faster here.
    if m < min_pallas_rows:
        y = (x2d.astype(jnp.float32) @ w_f32.T
             + bias.astype(jnp.float32)).astype(out_dtype)
        return y.reshape(*lead, out_f)

    # ---- Row packing: fuse PACK rows into one packed row ---------------------
    pack, need_pad = _choose_pack(m)
    m_pad = ((m + pack - 1) // pack) * pack
    if need_pad:
        # Rare case (m not divisible by 12/8/6/4): zero-pad the row axis.
        x2d = jnp.pad(x2d, ((0, m_pad - m), (0, 0)))
    mp = m_pad // pack
    K = pack * in_f                                # <= 120  (one MXU pass)
    N = pack * out_f                               # <= 60

    x_packed = x2d.reshape(mp, K)                  # free reshape (row-major)
    # Block-diagonal weight: y_packed = x_packed @ kron(I_pack, W.T) + tile(b)
    w_bd = jnp.kron(jnp.eye(pack, dtype=jnp.float32), w_f32.T)       # [K, N]
    b_row = jnp.tile(bias.astype(jnp.float32), pack).reshape(1, N)   # [1, N]

    # ---- Tile the packed-row axis --------------------------------------------
    # block_rows original rows per step -> packed rows, multiple of 8 sublanes.
    block_packed = max(8, (block_rows // pack) // 8 * 8)
    if mp <= 8:
        tmp = mp                                   # single full-array block
    else:
        # Keep >= 4 grid steps (>= 2 blocks per TensorCore on v7x megacore),
        # never exceed the requested block, never exceed the (rounded) array.
        target = max(8, ((-(-mp // 4)) + 7) // 8 * 8)
        tmp = min(block_packed, target, ((mp + 7) // 8) * 8)
    grid_m = pl.cdiv(mp, tmp)                      # last block may be partial

    cost = pl.CostEstimate(
        flops=2 * m * in_f * out_f,
        bytes_accessed=(m_pad * in_f * jnp.dtype(x.dtype).itemsize
                        + m_pad * out_f * jnp.dtype(out_dtype).itemsize
                        + K * N * 4 + N * 4),
        transcendentals=0,
    )

    y_packed = pl.pallas_call(
        _packed_linear_kernel,
        out_shape=jax.ShapeDtypeStruct((mp, N), out_dtype),
        grid=(grid_m,),
        in_specs=[
            pl.BlockSpec((tmp, K), lambda i: (i, 0)),   # packed x tile (pipelined)
            pl.BlockSpec((K, N), lambda i: (0, 0)),     # block-diag weight (resident)
            pl.BlockSpec((1, N), lambda i: (0, 0)),     # bias row (resident)
        ],
        out_specs=pl.BlockSpec((tmp, N), lambda i: (i, 0)),
        compiler_params=pltpu.CompilerParams(
            dimension_semantics=("parallel",),
            vmem_limit_bytes=40 * 1024 * 1024,          # fits v5e/v6e/v7x with headroom
        ),
        cost_estimate=cost,
    )(x_packed, w_bd, b_row)

    # (mp, N) row-major is exactly (m_pad, out_f): free reshape, no transpose.
    y = y_packed.reshape(m_pad, out_f)
    if need_pad:
        y = y[:m]
    return y.reshape(*lead, out_f)


def init_params(key):
    """Deterministic init matching nn.Linear(10, 5) shapes.

    PyTorch default init: U(-1/sqrt(in_features), 1/sqrt(in_features)).
    """
    k_w, k_b = jax.random.split(key)
    bound = 1.0 / jnp.sqrt(10.0)
    weight = jax.random.uniform(k_w, (5, 10), jnp.float32, -bound, bound)
    bias = jax.random.uniform(k_b, (5,), jnp.float32, -bound, bound)
    return weight, bias


# TODO(synk): nn.Conv2d(3, 64, 3) exists in __init__ but is unused in forward();
# it is deliberately not implemented.


if __name__ == "__main__":
    key = jax.random.PRNGKey(0)
    k_params, k_x1, k_x2, k_x3, k_x4 = jax.random.split(key, 5)

    weight, bias = init_params(k_params)
    fwd = jax.jit(nelf_forward, static_argnames=("block_rows", "min_pallas_rows"))

    # 1) Small shape implied by the module (batch=2, seq=8, features=10),
    #    forced through the Pallas path (single full-array packed block).
    x_small = jax.random.normal(k_x1, (2, 8, 10), jnp.float32)
    out_small = jax.block_until_ready(fwd(x_small, weight, bias, min_pallas_rows=0))
    ref_small = x_small @ weight.T + bias
    assert out_small.shape == (2, 8, 5)
    assert jnp.allclose(out_small, ref_small, atol=1e-5, rtol=1e-5)

    # 2) Same input through the default tiny-M fast path (no Pallas).
    out_fast = jax.block_until_ready(fwd(x_small, weight, bias))
    assert jnp.allclose(out_fast, ref_small, atol=1e-5, rtol=1e-5)

    # 3) Tiled, pipelined path: M = 4096 rows -> PACK=8, 4 grid steps.
    x_big = jax.random.normal(k_x2, (2, 2048, 10), jnp.float32)
    out_big = jax.block_until_ready(fwd(x_big, weight, bias))
    ref_big = x_big @ weight.T + bias
    assert out_big.shape == (2, 2048, 5)
    assert jnp.allclose(out_big, ref_big, atol=1e-4, rtol=1e-4)

    # 4) Ragged grid: M = 2100 (PACK=12, no padding), partial last block masked.
    x_ragged = jax.random.normal(k_x3, (3, 700, 10), jnp.float32)
    out_ragged = jax.block_until_ready(fwd(x_ragged, weight, bias, min_pallas_rows=0))
    ref_ragged = x_ragged @ weight.T + bias
    assert out_ragged.shape == (3, 700, 5)
    assert jnp.allclose(out_ragged, ref_ragged, atol=1e-4, rtol=1e-4)

    # 5) Odd M = 997: exercises the zero-pad-to-multiple-of-12 fallback.
    x_odd = jax.random.normal(k_x4, (1, 997, 10), jnp.float32)
    out_odd = jax.block_until_ready(fwd(x_odd, weight, bias, min_pallas_rows=0))
    ref_odd = x_odd @ weight.T + bias
    assert out_odd.shape == (1, 997, 5)
    assert jnp.allclose(out_odd, ref_odd, atol=1e-4, rtol=1e-4)

    print("KERNEL_OK")
</pallas_src>

<mosaic_0001>
module attributes {stable_mosaic.version = 11 : i64} {
  func.func @_packed_linear_kernel(%arg0: i32, %arg1: memref<2x80xf32, #tpu.memory_space<vmem>>, %arg2: memref<80x40xf32, #tpu.memory_space<vmem>>, %arg3: memref<1x40xf32, #tpu.memory_space<vmem>>, %arg4: memref<2x40xf32, #tpu.memory_space<vmem>>) attributes {dimension_semantics = [#tpu.dimension_semantics<parallel>], iteration_bounds = array<i64: 1>, scalar_prefetch = 0 : i64, scratch_operands = 0 : i64, tpu.core_type = #tpu.core_type<tc>, window_params = [{transform_indices = @transform_0, window_bounds = array<i64: 2, 80>}, {pipeline_mode = #tpu.pipeline_mode<synchronous>, transform_indices = @transform_1, window_bounds = array<i64: 80, 40>}, {pipeline_mode = #tpu.pipeline_mode<synchronous>, transform_indices = @transform_2, window_bounds = array<i64: 1, 40>}, {transform_indices = @transform_3, window_bounds = array<i64: 2, 40>}]} {
    %c0 = arith.constant 0 : index
    %c0_0 = arith.constant 0 : index
    %0 = vector.load %arg1[%c0, %c0_0] : memref<2x80xf32, #tpu.memory_space<vmem>>, vector<2x80xf32>
    %c0_1 = arith.constant 0 : index
    %c0_2 = arith.constant 0 : index
    %1 = vector.load %arg2[%c0_1, %c0_2] : memref<80x40xf32, #tpu.memory_space<vmem>>, vector<80x40xf32>
    %cst = arith.constant dense<0.000000e+00> : vector<2x40xf32>
    %2 = tpu.matmul %0, %1, %cst {dimension_numbers = #tpu.dot_dimension_numbers<[1], [0], [0], [1], [0, 0, 1, 1], [], []>} : vector<2x80xf32>, vector<80x40xf32>, vector<2x40xf32> -> vector<2x40xf32>
    %c0_3 = arith.constant 0 : index
    %c0_4 = arith.constant 0 : index
    %3 = vector.load %arg3[%c0_3, %c0_4] : memref<1x40xf32, #tpu.memory_space<vmem>>, vector<1x40xf32>
    %4 = vector.broadcast %3 : vector<1x40xf32> to vector<2x40xf32>
    %5 = arith.addf %2, %4 : vector<2x40xf32>
    %c0_5 = arith.constant 0 : index
    %c0_6 = arith.constant 0 : index
    %6 = vector.load %arg4[%c0_5, %c0_6] : memref<2x40xf32, #tpu.memory_space<vmem>>, vector<2x40xf32>
    tpu.vector_store %arg4[%c0_5, %c0_6], %5 {strides = array<i32>} : memref<2x40xf32, #tpu.memory_space<vmem>>, vector<2x40xf32>,
    return
  }
  func.func @transform_0(%arg0: i32) -> (i32, i32) {
    %c0_i32 = arith.constant 0 : i32
    %c0_i32_0 = arith.constant 0 : i32
    return %arg0, %c0_i32 : i32, i32
  }
  func.func @transform_1(%arg0: i32) -> (i32, i32) {
    %c0_i32 = arith.constant 0 : i32
    %c0_i32_0 = arith.constant 0 : i32
    %c0_i32_1 = arith.constant 0 : i32
    return %c0_i32, %c0_i32_0 : i32, i32
  }
  func.func @transform_2(%arg0: i32) -> (i32, i32) {
    %c0_i32 = arith.constant 0 : i32
    %c0_i32_0 = arith.constant 0 : i32
    %c0_i32_1 = arith.constant 0 : i32
    return %c0_i32, %c0_i32_0 : i32, i32
  }
  func.func @transform_3(%arg0: i32) -> (i32, i32) {
    %c0_i32 = arith.constant 0 : i32
    %c0_i32_0 = arith.constant 0 : i32
    return %arg0, %c0_i32 : i32, i32
  }
}

</mosaic_0001>

<bundles_post_ra>
// kernel: tile.9
= control target key start
LH: loop header
LB: loop body
LE: loop exit
PB: predicated region body
PF: predicated region fallthrough
CT: control target
= control target key end

     0   :  { %s69_s10 = smov 35   ;;  %s70_s11 = smov 25   ;;  %vm3_vm0 = vcmask 39936   ;;  %vm9_vm1 = vcmask 326936   ;;  %vm15_vm2 = vcmask 285936   ;;  %vm21_vm3 = vcmask 244936   ;;  %s113_s0 = inlined_call_operand.vmem [shape: f32[8,5], index: 0, kind: input, shape index: {}]   ;;  %s114_s1 = inlined_call_operand.vmem [shape: f32[1,40], index: 1, kind: output, shape index: {}]  }
   0x1   :  { %v55_v0 = vld [vmem:[%s113_s0 + $0x7] sm:$0x1]   ;;  %v57_v1 = vld [vmem:[%s113_s0 + $0x5] sm:$0x1]   ;;  %v56_v2 = vld [vmem:[%s113_s0 + $0x6] sm:$0x1]  }
   0x2   :  { %7 = vrot.lane.b32.xlu0 %v55_v0, %s69_s10  ;;  %19 = vrot.lane.b32.xlu1 %v57_v1, %s70_s11  ;;  %v58_v3 = vld [vmem:[%s113_s0 + $0x4] sm:$0x1]   ;;  %v2_v4 = vld [vmem:[%s113_s0] sm:$0x1]   ;;  %s71_s18 = smov 30   ;;  %s72_s19 = smov 20  }
   0x3   :  { %4 = vst.msk [vmem:[#allocation0] sm:$0x1] %vm3_vm0, %v2_v4   ;;  %v59_v5 = vld [vmem:[%s113_s0 + $0x3] sm:$0x1]   ;;  %v60_v6 = vld [vmem:[%s113_s0 + $0x2] sm:$0x1]  }
   0x4   :  { %s73_s24 = smov 15   ;;  %s74_s25 = smov 10   ;;  %v61_v7 = vld [vmem:[%s113_s0 + $0x1] sm:$0x1]   ;;  %vm27_vm4 = vcmask 203936   ;;  %vm33_vm5 = vcmask 162936  }
   0x5   :  { %s75_s0 = smov 5   ;;  %vm39_vm6 = vcmask 121936   ;;  %vm45_vm7 = vcmask 80936  }
   0x6   :  { %13 = vrot.lane.b32.xlu0 %v56_v2, %s71_s18  ;;  %25 = vrot.lane.b32.xlu1 %v58_v3, %s72_s19 }
   0xa   :  { %31 = vrot.lane.b32.xlu0 %v59_v5, %s73_s24  ;;  %37 = vrot.lane.b32.xlu1 %v60_v6, %s74_s25 }
   0xe   :  { %43 = vrot.lane.b32.xlu0 %v61_v7, %s75_s0 }
  0x74   :  { %v8_v8 = vpop.permute.xlu0 %7   ;;  %v20_v9 = vpop.permute.xlu1 %19  }
  0x75   :  { %10 = vst.msk [vmem:[#allocation0] sm:$0x1] %vm9_vm1, %v8_v8  }
  0x78   :  { %v14_v10 = vpop.permute.xlu0 %13   ;;  %v26_v11 = vpop.permute.xlu1 %25  }
  0x79   :  { %16 = vst.msk [vmem:[#allocation0] sm:$0x1] %vm15_vm2, %v14_v10  }
  0x7a   :  { %22 = vst.msk [vmem:[#allocation0] sm:$0x1] %vm21_vm3, %v20_v9  }
  0x7b   :  { %28 = vst.msk [vmem:[#allocation0] sm:$0x1] %vm27_vm4, %v26_v11  }
  0x7c   :  { %v32_v12 = vpop.permute.xlu0 %31   ;;  %v38_v13 = vpop.permute.xlu1 %37  }
  0x7d   :  { %34 = vst.msk [vmem:[#allocation0] sm:$0x1] %vm33_vm5, %v32_v12  }
  0x7e   :  { %40 = vst.msk [vmem:[#allocation0] sm:$0x1] %vm39_vm6, %v38_v13  }
  0x80   :  { %v44_v14 = vpop.permute.xlu0 %43  }
  0x81   :  { %46 = vst.msk [vmem:[#allocation0] sm:$0x1] %vm45_vm7, %v44_v14  }
  0x88   :  { %v51_v15 = vld [vmem:[#allocation0] sm:$0x1] }
  0x89   :  { %54 = vst [vmem:[%s114_s1] sm:$0x1] %v51_v15 }

// kernel: tile.8
= control target key start
LH: loop header
LB: loop body
LE: loop exit
PB: predicated region body
PF: predicated region fallthrough
CT: control target
= control target key end

     0   :  { %s22_s0 = inlined_call_operand.vmem [shape: f32[5], index: 0, kind: input, shape index: {}]   ;;  %s23_s1 = inlined_call_operand.vmem [shape: f32[8,5], index: 1, kind: output, shape index: {}]  }
   0x1   :  { %v4_v0 = vld [vmem:[%s22_s0] ss:$0 sm:$0xff] }
   0x2   :  { %5 = vst [vmem:[%s23_s1] sm:$0xff] %v4_v0 }

// kernel: nelf_forward.1
= control target key start
LH: loop header
LB: loop body
LE: loop exit
PB: predicated region body
PF: predicated region fallthrough
CT: control target
= control target key end

     0   :  { %v150_v0 = vmov 0.0   ;;  %vm151_vm0 = vmmov 0   ;;  %vm32_vm1 = vcmask 654336   ;;  %vm106_vm2 = vcmask 320512   ;;  %s211_s1 = inlined_call_operand.vmem [shape: f32[80,40], index: 1, kind: input, shape index: {}]   ;;  %s212_s0 = inlined_call_operand.vmem [shape: f32[2,80], index: 0, kind: input, shape index: {}]   ;;  %s213_s2 = inlined_call_operand.vmem [shape: f32[1,40], index: 2, kind: input, shape index: {}]   ;;  %s214_s3 = inlined_call_operand.vmem [shape: f32[2,40], index: 3, kind: output, shape index: {}]  }
   0x1   :  { %125 = vmatprep.subr.mxu0 %v150_v0  ;;  %v24_v1 = vld [vmem:[%s211_s1 + $0x48] sm:$0xff]  ;;  %v23_v2 = vld [vmem:[%s211_s1 + $0x40] sm:$0xff]  ;;  %145 = vmatprep.mubr.msk.f32.mxu0 %vm151_vm0, %v150_v0  ;;  %v22_v3 = vld [vmem:[%s211_s1 + $0x38] sm:$0xff] }
   0x2   :  { %126 = vmatpush3.msra.mxu0 %v24_v1  ;;  %v21_v4 = vld [vmem:[%s211_s1 + $0x30] sm:$0xff]  ;;  %v20_v5 = vld [vmem:[%s211_s1 + $0x28] sm:$0xff]  ;;  %v19_v6 = vld [vmem:[%s211_s1 + $0x20] sm:$0xff] }
   0x3   :  { %127 = vmatprep.subr.mxu0 %v150_v0  ;;  %v18_v7 = vld [vmem:[%s211_s1 + $0x18] sm:$0xff]  ;;  %v17_v8 = vld [vmem:[%s211_s1 + $0x10] sm:$0xff]  ;;  %v16_v9 = vld [vmem:[%s211_s1 + $0x8] sm:$0xff] }
   0x4   :  { %128 = vmatpush3.msra.mxu0 %v23_v2  ;;  %v15_v10 = vld [vmem:[%s211_s1] sm:$0xff] }
   0x5   :  { %129 = vmatprep.subr.mxu0 %v150_v0  ;;  %v14_v11 = vld [vmem:[%s212_s0] sm:$0x3] }
   0x6   :  { %130 = vmatpush3.msra.mxu0 %v22_v3  ;;  %v112_v12 = vld [vmem:[%s213_s2] ss:$0 sm:$0xff] }
   0x7   :  { %131 = vmatprep.subr.mxu0 %v150_v0 }
   0x8   :  { %132 = vmatpush3.msra.mxu0 %v21_v4 }
   0x9   :  { %133 = vmatprep.subr.mxu0 %v150_v0 }
   0xa   :  { %134 = vmatpush3.msra.mxu0 %v20_v5 }
   0xb   :  { %135 = vmatprep.subr.mxu0 %v150_v0 }
   0xc   :  { %136 = vmatpush3.msra.mxu0 %v19_v6 }
   0xd   :  { %137 = vmatprep.subr.mxu0 %v150_v0 }
   0xe   :  { %138 = vmatpush3.msra.mxu0 %v18_v7 }
   0xf   :  { %139 = vmatprep.subr.mxu0 %v150_v0 }
  0x10   :  { %140 = vmatpush3.msra.mxu0 %v17_v8 }
  0x11   :  { %141 = vmatprep.subr.mxu0 %v150_v0 }
  0x12   :  { %142 = vmatpush3.msra.mxu0 %v16_v9 }
  0x13   :  { %143 = vmatprep.subr.mxu0 %v150_v0 }
  0x14   :  { %144 = vmatpush3.msra.mxu0 %v15_v10 }
  0x15   :  { %146 = vmatmul.mubr.msk.f32.vlgmr.msra.gmra.mxu0 %vm32_vm1, %v14_v11 }
  0xd5   :  { %v102_v13 = vpop.f32.mrf.mxu0 }
  0xd6   :  { %v103_v14 = vadd.f32 %v112_v12, %v102_v13 }
  0xd7   :  { %v147_v15 = vpop.f32.mrf.mxu0 }
  0xd8   :  { %107 = vst.msk [vmem:[%s214_s3] sm:$0x3] %vm106_vm2, %v103_v14 }

</bundles_post_ra>
